<compile_context>
chip_gen: v6e
topology: v6e:2x2x1
jax: 0.10.0
libtpu: 0.0.40
codegen_flags: <defaults>
</compile_context>

<pallas_src>
import jax
import jax.numpy as jnp
from jax.experimental import pallas as pl
from jax.experimental.pallas import tpu as pltpu


def _round_up(x, m):
    return ((x + m - 1) // m) * m


def _decoder_kernel(x_ref, w1_ref, s1_ref, b1_ref, w2_ref, b2_ref, o_ref):
    # x_ref:  (1, C_in, tl)  NCW input tile (batch dim indexed away with [0])
    # w1_ref: (C_hid, C_in)  conv1 weight (out, in), compute dtype
    # s1_ref: (C_hid, 1)     folded BN scale (f32)
    # b1_ref: (C_hid, 1)     folded conv1 bias + BN shift (f32)
    # w2_ref: (3, C_hid)     conv2 weight (out, in), compute dtype
    # b2_ref: (3, 1)         conv2 bias (f32)
    # o_ref:  (1, 3, tl)     output tile (lane-dense: last dim is tl)
    x = x_ref[0]                                                     # (C_in, tl)
    h = jnp.dot(w1_ref[...], x, preferred_element_type=jnp.float32)  # (C_hid, tl) f32
    h = h * s1_ref[...] + b1_ref[...]                                # BN(eval) fused w/ bias
    h = jnp.maximum(h, 0.0)                                          # ReLU (f32)
    y = jnp.dot(w2_ref[...], h.astype(w2_ref.dtype),
                preferred_element_type=jnp.float32) + b2_ref[...]    # (3, tl) f32
    o_ref[0] = jnp.tanh(y).astype(o_ref.dtype)


def opt_decoder_pallas(x_ncl, params, *, tl=512, compute_dtype=jnp.float32,
                       vmem_limit_bytes=None):
    """x_ncl: (N, C_in, L) float32.  Returns (N, 3, L) float32.

    tl: lane tile along L (rounded to a multiple of 128).  Use bigger values
        (512-1024) for large problems; keep the double-buffered x tile
        (2 * C_in * tl * itemsize) well inside VMEM (64 MiB on v7x,
        128 MiB on v5e/v6e) -- raise `vmem_limit_bytes` if you push past the
        default scoped limit.
    compute_dtype: jnp.float32 or jnp.bfloat16 for the matmul operands
        (accumulation and the elementwise epilogue stay f32).
    """
    N, C_in, L = x_ncl.shape
    w1, s1, b1, w2, b2 = params
    C_hid = w1.shape[0]

    # Lane tile: multiple of 128 (lane-dense (8,128)-aligned loads/stores),
    # never larger than needed for this L.
    tl = max(128, _round_up(min(int(tl), _round_up(L, 128)), 128))
    Lp = _round_up(L, tl)
    if Lp != L:
        x_ncl = jnp.pad(x_ncl, ((0, 0), (0, 0), (0, Lp - L)))

    cdt = jnp.dtype(compute_dtype)
    x_c = x_ncl.astype(cdt)
    w1_c = w1.astype(cdt)
    w2_c = w2.astype(cdt)

    grid = (N, Lp // tl)

    flops = 2 * N * Lp * (C_in * C_hid + C_hid * 3)
    transcendentals = N * Lp * 3
    bytes_accessed = (N * Lp * C_in * cdt.itemsize          # x
                      + N * Lp * 3 * 4                      # out (f32)
                      + (C_hid * C_in + 3 * C_hid) * cdt.itemsize
                      + (2 * C_hid + 3) * 4)                # scale/bias

    out = pl.pallas_call(
        _decoder_kernel,
        out_shape=jax.ShapeDtypeStruct((N, 3, Lp), jnp.float32),
        grid_spec=pltpu.PrefetchScalarGridSpec(
            num_scalar_prefetch=0,
            grid=grid,
            in_specs=[
                pl.BlockSpec((1, C_in, tl), lambda n, l: (n, 0, l)),
                pl.BlockSpec((C_hid, C_in), lambda n, l: (0, 0)),
                pl.BlockSpec((C_hid, 1), lambda n, l: (0, 0)),
                pl.BlockSpec((C_hid, 1), lambda n, l: (0, 0)),
                pl.BlockSpec((3, C_hid), lambda n, l: (0, 0)),
                pl.BlockSpec((3, 1), lambda n, l: (0, 0)),
            ],
            out_specs=pl.BlockSpec((1, 3, tl), lambda n, l: (n, 0, l)),
        ),
        compiler_params=pltpu.CompilerParams(
            dimension_semantics=("parallel", "parallel"),
            vmem_limit_bytes=vmem_limit_bytes),
        cost_estimate=pl.CostEstimate(
            flops=flops,
            transcendentals=transcendentals,
            bytes_accessed=bytes_accessed),
    )(x_c, w1_c, s1, b1, w2_c, b2)

    return out[:, :, :L] if Lp != L else out


def make_params(key, bottleneck_size):
    """Deterministic synthetic parameters matching the module's shapes."""
    C_in = bottleneck_size
    C_hid = bottleneck_size // 2
    ks = jax.random.split(key, 6)
    # conv1: weight (C_hid, C_in, 1) -> (C_hid, C_in), bias (C_hid,)
    w1 = jax.random.normal(ks[0], (C_hid, C_in), jnp.float32) * 0.05
    b1 = jax.random.normal(ks[1], (C_hid,), jnp.float32) * 0.05
    # conv2 (see TODO above): weight (3, C_hid, 1) -> (3, C_hid), bias (3,)
    w2 = jax.random.normal(ks[2], (3, C_hid), jnp.float32) * 0.05
    b2 = jax.random.normal(ks[3], (3,), jnp.float32) * 0.05
    # bn1 (eval mode): gamma, beta, running_mean, running_var
    gamma = 1.0 + 0.1 * jax.random.normal(ks[4], (C_hid,), jnp.float32)
    beta = 0.1 * jax.random.normal(ks[5], (C_hid,), jnp.float32)
    rmean = jnp.zeros((C_hid,), jnp.float32)
    rvar = jnp.ones((C_hid,), jnp.float32)
    eps = 1e-5

    # Fold BN into scale/bias:  bn(z) = z*s + t,  s = gamma/sqrt(var+eps)
    s = gamma / jnp.sqrt(rvar + eps)
    t = beta - rmean * s
    fused_bias1 = b1 * s + t             # applied after (W1 @ x) * s

    return (w1,
            s.reshape(C_hid, 1),
            fused_bias1.reshape(C_hid, 1),
            w2,
            b2.reshape(3, 1))


def reference(x_ncl, params):
    """Pure-JAX (f32) reference for correctness checking."""
    w1, s1, b1, w2, b2 = params
    h = jnp.einsum('oc,ncl->nol', w1, x_ncl)
    h = jnp.maximum(h * s1[None] + b1[None], 0.0)
    y = jnp.einsum('oc,ncl->nol', w2, h) + b2[None]
    return jnp.tanh(y)


if __name__ == "__main__":
    bottleneck_size = 256          # module default is 1024; TPU-friendly small demo
    N, L = 2, 512

    key = jax.random.PRNGKey(0)
    k_x, k_p = jax.random.split(key)
    x = jax.random.normal(k_x, (N, bottleneck_size, L), jnp.float32)
    params = make_params(k_p, bottleneck_size)

    ref = reference(x, params)

    # f32 matmul path.
    out = jax.block_until_ready(opt_decoder_pallas(x, params, tl=256))
    assert out.shape == (N, 3, L)
    assert jnp.allclose(out, ref, atol=1e-5, rtol=1e-5), "f32 mismatch vs reference"

    # bf16 matmul inputs / f32 accumulation path (v6e / v7x MXU).
    out_bf16 = jax.block_until_ready(
        opt_decoder_pallas(x, params, tl=256, compute_dtype=jnp.bfloat16))
    assert jnp.allclose(out_bf16, ref, atol=3e-2, rtol=3e-2), "bf16 mismatch vs reference"

    # L not a multiple of the lane tile: padded + sliced path.
    x2 = x[:, :, :300]
    out2 = jax.block_until_ready(opt_decoder_pallas(x2, params, tl=256))
    assert out2.shape == (N, 3, 300)
    assert jnp.allclose(out2, reference(x2, params), atol=1e-5, rtol=1e-5), \
        "padded-L mismatch vs reference"

    print("KERNEL_OK")
</pallas_src>

<mosaic_0001>
module attributes {stable_mosaic.version = 11 : i64} {
  func.func @_decoder_kernel(%arg0: i32, %arg1: i32, %arg2: memref<1x256x256xf32, #tpu.memory_space<vmem>>, %arg3: memref<128x256xf32, #tpu.memory_space<vmem>>, %arg4: memref<128x1xf32, #tpu.memory_space<vmem>>, %arg5: memref<128x1xf32, #tpu.memory_space<vmem>>, %arg6: memref<3x128xf32, #tpu.memory_space<vmem>>, %arg7: memref<3x1xf32, #tpu.memory_space<vmem>>, %arg8: memref<1x3x256xf32, #tpu.memory_space<vmem>>) attributes {dimension_semantics = [#tpu.dimension_semantics<parallel>, #tpu.dimension_semantics<parallel>], iteration_bounds = array<i64: 2, 2>, scalar_prefetch = 0 : i64, scratch_operands = 0 : i64, tpu.core_type = #tpu.core_type<tc>, window_params = [{transform_indices = @transform_0, window_bounds = array<i64: 1, 256, 256>}, {pipeline_mode = #tpu.pipeline_mode<synchronous>, transform_indices = @transform_1, window_bounds = array<i64: 128, 256>}, {pipeline_mode = #tpu.pipeline_mode<synchronous>, transform_indices = @transform_2, window_bounds = array<i64: 128, 1>}, {pipeline_mode = #tpu.pipeline_mode<synchronous>, transform_indices = @transform_3, window_bounds = array<i64: 128, 1>}, {pipeline_mode = #tpu.pipeline_mode<synchronous>, transform_indices = @transform_4, window_bounds = array<i64: 3, 128>}, {pipeline_mode = #tpu.pipeline_mode<synchronous>, transform_indices = @transform_5, window_bounds = array<i64: 3, 1>}, {transform_indices = @transform_6, window_bounds = array<i64: 1, 3, 256>}]} {
    %c0 = arith.constant 0 : index
    %c0_0 = arith.constant 0 : index
    %c0_1 = arith.constant 0 : index
    %0 = vector.load %arg2[%c0, %c0_0, %c0_1] : memref<1x256x256xf32, #tpu.memory_space<vmem>>, vector<1x256x256xf32>
    %1 = vector.shape_cast %0 : vector<1x256x256xf32> to vector<256x256xf32>
    %c0_2 = arith.constant 0 : index
    %c0_3 = arith.constant 0 : index
    %2 = vector.load %arg3[%c0_2, %c0_3] : memref<128x256xf32, #tpu.memory_space<vmem>>, vector<128x256xf32>
    %cst = arith.constant dense<0.000000e+00> : vector<128x256xf32>
    %3 = tpu.matmul %2, %1, %cst {dimension_numbers = #tpu.dot_dimension_numbers<[1], [0], [0], [1], [0, 0, 1, 1], [], []>} : vector<128x256xf32>, vector<256x256xf32>, vector<128x256xf32> -> vector<128x256xf32>
    %c0_4 = arith.constant 0 : index
    %c0_5 = arith.constant 0 : index
    %4 = vector.load %arg4[%c0_4, %c0_5] : memref<128x1xf32, #tpu.memory_space<vmem>>, vector<128x1xf32>
    %5 = vector.broadcast %4 : vector<128x1xf32> to vector<128x256xf32>
    %6 = arith.mulf %3, %5 : vector<128x256xf32>
    %c0_6 = arith.constant 0 : index
    %c0_7 = arith.constant 0 : index
    %7 = vector.load %arg5[%c0_6, %c0_7] : memref<128x1xf32, #tpu.memory_space<vmem>>, vector<128x1xf32>
    %8 = vector.broadcast %7 : vector<128x1xf32> to vector<128x256xf32>
    %9 = arith.addf %6, %8 : vector<128x256xf32>
    %cst_8 = arith.constant 0.000000e+00 : f32
    %10 = vector.broadcast %cst_8 : f32 to vector<128x256xf32>
    %11 = arith.maximumf %9, %10 : vector<128x256xf32>
    %c0_9 = arith.constant 0 : index
    %c0_10 = arith.constant 0 : index
    %12 = vector.load %arg6[%c0_9, %c0_10] : memref<3x128xf32, #tpu.memory_space<vmem>>, vector<3x128xf32>
    %cst_11 = arith.constant dense<0.000000e+00> : vector<3x256xf32>
    %13 = tpu.matmul %12, %11, %cst_11 {dimension_numbers = #tpu.dot_dimension_numbers<[1], [0], [0], [1], [0, 0, 1, 1], [], []>} : vector<3x128xf32>, vector<128x256xf32>, vector<3x256xf32> -> vector<3x256xf32>
    %c0_12 = arith.constant 0 : index
    %c0_13 = arith.constant 0 : index
    %14 = vector.load %arg7[%c0_12, %c0_13] : memref<3x1xf32, #tpu.memory_space<vmem>>, vector<3x1xf32>
    %15 = vector.broadcast %14 : vector<3x1xf32> to vector<3x256xf32>
    %16 = arith.addf %13, %15 : vector<3x256xf32>
    %17 = math.tanh %16 : vector<3x256xf32>
    %c0_14 = arith.constant 0 : index
    %c0_15 = arith.constant 0 : index
    %c0_16 = arith.constant 0 : index
    %18 = vector.load %arg8[%c0_14, %c0_15, %c0_16] : memref<1x3x256xf32, #tpu.memory_space<vmem>>, vector<1x3x256xf32>
    %19 = vector.shape_cast %18 : vector<1x3x256xf32> to vector<3x256xf32>
    %20 = vector.shape_cast %17 : vector<3x256xf32> to vector<1x3x256xf32>
    tpu.vector_store %arg8[%c0_14, %c0_15, %c0_16], %20 {strides = array<i32>} : memref<1x3x256xf32, #tpu.memory_space<vmem>>, vector<1x3x256xf32>,
    return
  }
  func.func @transform_0(%arg0: i32, %arg1: i32) -> (i32, i32, i32) {
    %c0_i32 = arith.constant 0 : i32
    %c0_i32_0 = arith.constant 0 : i32
    return %arg0, %c0_i32, %arg1 : i32, i32, i32
  }
  func.func @transform_1(%arg0: i32, %arg1: i32) -> (i32, i32) {
    %c0_i32 = arith.constant 0 : i32
    %c0_i32_0 = arith.constant 0 : i32
    %c0_i32_1 = arith.constant 0 : i32
    return %c0_i32, %c0_i32_0 : i32, i32
  }
  func.func @transform_2(%arg0: i32, %arg1: i32) -> (i32, i32) {
    %c0_i32 = arith.constant 0 : i32
    %c0_i32_0 = arith.constant 0 : i32
    %c0_i32_1 = arith.constant 0 : i32
    return %c0_i32, %c0_i32_0 : i32, i32
  }
  func.func @transform_3(%arg0: i32, %arg1: i32) -> (i32, i32) {
    %c0_i32 = arith.constant 0 : i32
    %c0_i32_0 = arith.constant 0 : i32
    %c0_i32_1 = arith.constant 0 : i32
    return %c0_i32, %c0_i32_0 : i32, i32
  }
  func.func @transform_4(%arg0: i32, %arg1: i32) -> (i32, i32) {
    %c0_i32 = arith.constant 0 : i32
    %c0_i32_0 = arith.constant 0 : i32
    %c0_i32_1 = arith.constant 0 : i32
    return %c0_i32, %c0_i32_0 : i32, i32
  }
  func.func @transform_5(%arg0: i32, %arg1: i32) -> (i32, i32) {
    %c0_i32 = arith.constant 0 : i32
    %c0_i32_0 = arith.constant 0 : i32
    %c0_i32_1 = arith.constant 0 : i32
    return %c0_i32, %c0_i32_0 : i32, i32
  }
  func.func @transform_6(%arg0: i32, %arg1: i32) -> (i32, i32, i32) {
    %c0_i32 = arith.constant 0 : i32
    %c0_i32_0 = arith.constant 0 : i32
    return %arg0, %c0_i32, %arg1 : i32, i32, i32
  }
}

</mosaic_0001>

<bundles_post_ra>
// kernel: tpu_custom_call.1
= control target key start
LH: loop header
LB: loop body
LE: loop exit
PB: predicated region body
PF: predicated region fallthrough
CT: control target
= control target key end

     0   :  { %s1758_s0 = inlined_call_operand.hbm [shape: f32[2,256,512], index: 0, kind: input, shape index: {}]   ;;  %s1759_s1 = inlined_call_operand.vmem [shape: f32[128,256], index: 1, kind: input, shape index: {}]   ;;  %s1760_s2 = inlined_call_operand.vmem [shape: f32[128,1], index: 2, kind: input, shape index: {}]   ;;  %s1761_s3 = inlined_call_operand.vmem [shape: f32[128,1], index: 3, kind: input, shape index: {}]   ;;  %s1762_s4 = inlined_call_operand.vmem [shape: f32[3,128], index: 4, kind: input, shape index: {}]   ;;  %s1763_s5 = inlined_call_operand.vmem [shape: f32[3,1], index: 5, kind: input, shape index: {}]   ;;  %s1764_s6 = inlined_call_operand.vmem [shape: f32[2,3,512], index: 6, kind: output, shape index: {}]  }
   0x1   :  { %1766 = sst [smem:[#allocation13_spill]] %s1762_s4 }
   0x2   :  { %1767 = sst [smem:[#allocation14_spill]] %s1764_s6 }
   0x3   :  { %11 = vsyncpa [#allocation3], 0 }
   0x4   :  { %13 = vsyncpa [#allocation3 + $0x1], 0  ;;  %s1262_s21 = smov 0   ;;  %s1264_s22 = smov 0  }
   0x5   :  { %s1266_s23 = smov 0   ;;  %s1268_s24 = smov 0  }
   0x6   :  { %s1270_s25 = smov 0   ;;  %s1272_s26 = smov 0  }
   0x7   :  { %s1274_s27 = smov 0   ;;  %s1276_s28 = smov 0  }
   0x8 LB: > { %s1028_s29 = sadd.s32 4294967295, %s1219_s28   ;;  %s28_s30 = sadd.s32 1, %s1211_s26  ;;  %s1219_s28 = sphi %s1276_s28, %s19_s28   ;;  %s1215_s27 = sphi %s1274_s27, %s1795_s27   ;;  %s1211_s26 = sphi %s1272_s26, %s1794_s26   ;;  %s1207_s25 = sphi %s1270_s25, %s1793_s25   ;;  %s1203_s24 = sphi %s1268_s24, %s1792_s24   ;;  %s1199_s23 = sphi %s1266_s23, %s1791_s23   ;;  %s1195_s22 = sphi %s1264_s22, %s1790_s22   ;;  %s1191_s21 = sphi %s1262_s21, %s1789_s21  }
   0x9   : > { %p29_p0 = scmp.ge.s32.totalorder %s28_s30, 2  ;;  %s31_s7 = sadd.s32 1, %s1215_s27 }
   0xa   : > { %s40_s8 = sadd.s32 1, %s1199_s23  ;;  %p47_p1 = scmp.ne.s32.totalorder %s1199_s23, %s1195_s22 }
   0xb   : > { %s1797_s30 = smov (%p29_p0, %s28_s30), 0  ;;  %s1799_s7 = smov (!%p29_p0, %s31_s7), %s1215_s27 }
   0xc   : > { %1768 = sst [smem:[#allocation5_spill]] %s1797_s30  ;;  %s36_s9 = ssub.s32 %s1211_s26, %s1797_s30 }
   0xd   : > { %p48_p2 = scmp.eq.s32.totalorder %s1219_s28, 0  ;;  %p33_p3 = scmp.ge.s32.totalorder %s1799_s7, 2 }
   0xe   : > { %p53_p4 = scmp.ne.s32.totalorder %s1195_s22, %s1191_s21  ;;  %p54_p6 = scmp.eq.s32.totalorder %s1028_s29, 0 }
   0xf   : > { %p1313_p5 = por %p48_p2, %p47_p1  ;;  %s1801_s7 = smov (%p33_p3, %s1799_s7), 0 }
  0x10   : > { %p1319_p7 = por %p54_p6, %p53_p4  ;;  %s35_s12 = ssub.s32 %s1215_s27, %s1801_s7 }
  0x11   : > { %p1049_p8 = scmp.lt.s32.totalorder %s1219_s28, 4  ;;  %s37_s13 = sor.u32 %s36_s9, %s35_s12 }
  0x12   : > { %s225_s14 = sand.u32 1, %s1199_s23   ;;  %p38_p9 = scmp.eq.s32.totalorder %s37_s13, 0 }
  0x13   : > { %s1032_s15 = sshll.u32 %s225_s14, 9  ;;  %s1033_s16 = sshll.u32 %s1211_s26, 1 }
  0x14   : > { %s1329_s17 = scalar_select %p38_p9, %s1199_s23, %s40_s8  }
  0x15   : > { %s1034_s18 = sshll.u32 %s1215_s27, 7  ;;  %s229_s20 = scalar_lea.vmem [#allocation2], %s1032_s15 }
  0x16   : > { %s235_s19 = sadd.s32 %s1034_s18, %s1033_s16  ;;  %s238_s21 = sshll.u32 %s229_s20, 4  ;;  %s239_s21 = int_to_ptr.vmem [resolvable:$true] %s238_s21 }
  0x17   : > { %s1035_s29 = sshll.u32 %s235_s19, 7  ;;  %p1339_p10 = pnand %p1049_p8, %p1313_p5 }
  0x18   : > { %s237_s4 = scalar_lea.hbm %s1758_s0, %s1035_s29  ;;  %s226_s12 = scalar_lea.sflag [#allocation3], %s225_s14 }
  0x19   : > { %p1127_p11 = pneg %p1339_p10  ;;  %s1138_s8 = scalar_lea.vmem %s239_s21, 8192 }
  0x1a   : > { %p1139_p12 = scmp.ne.s32.totalorder %s239_s21, %s1138_s8  ;;  %s1221_s13 = smov [#allocation2]  }
  0x1b   : > { %s1143_s15 = sshll.u32 %s1221_s13, 4  ;;  %s1144_s15 = int_to_ptr.vmem [resolvable:$false] %s1143_s15 }
  0x1c   : > { %p1141_p13 = pnand %p1139_p12, %p1127_p11  ;;  %s1145_s16 = scalar_lea.vmem %s1144_s15, 16384 }
  0x1d   : > { %p1146_p1 = scmp.lt.s32.totalorder %s239_s21, %s1144_s15  ;;  %p1147_p2 = scmp.lt.s32.totalorder %s1145_s16, %s1138_s8 }
  0x1e   : > { %p1142_p0 = pneg %p1141_p13 }
  0x1f   : > { %p1148_p3 = por %p1147_p2, %p1146_p1 }
  0x21   : > { %p1149_p4 = pnand %p1148_p3, %p1142_p0 }
  0x23   : > { %1152 = shalt.err (!%p1149_p4)
}
  0x24   : > { %s1222_s6 = smov 512   ;;  %s1223_s30 = smov 256  }
  0x25   : > { %s1224_s10 = smov 16   ;;  %p1036_p5 = scmp.ge.s32.totalorder %s1219_s28, 1 }
  0x26   : > { %1048 = dma.hbm_to_vmem [thread:$0]  (!%p1339_p10), %s237_s4, 8192, %s239_s21, %s226_s12, %s1222_s6, %s1223_s30, %s1224_s10  }
  0x27   : > { %p246_p6 = scmp.lt.s32.totalorder %s1219_s28, 5 }
  0x29   : > { %p247_p8 = pnand %p1036_p5, %p246_p6 }
  0x2b   : > { %250 = sbr.rel (%p247_p8) target bundleno = 625 (0x271), region = 44 }
  0x30   : > { %s252_s14 = sand.u32 1, %s1195_s22  }
  0x31   : > { %s1037_s18 = sshll.u32 %s252_s14, 9  ;;  %s253_s19 = scalar_lea.sflag [#allocation3], %s252_s14 }
  0x32   : > { %s1350_s20 = scalar_lea.vmem [#allocation2], %s1037_s18 }
  0x33   : > { %1186 = dma.done.wait (%p1319_p7), %s253_s19, 8192  }
  0x34   : > { %1188 = vsyncadd (%p1319_p7), %s253_s19, 4294959104  ;;  %v1225_v0 = vmov 0   ;;  %v331_v1 = vld [vmem:[%s1350_s20 + $0xf8] sm:$0xff]  ;;  %v330_v2 = vld [vmem:[%s1350_s20 + $0xf0] sm:$0xff]  ;;  %s1786_s19 = sld [smem:[#allocation13_spill]]  ;;  %s1038_s4 = sshll.u32 %s1203_s24, 1 }
  0x35   : > { %1120 = vset.pattern.permute.xlu1 %v1225_v0  ;;  %1119 = vset.pattern.permute.xlu0 %v1225_v0  ;;  %v329_v3 = vld [vmem:[%s1350_s20 + $0xe8] sm:$0xff]  ;;  %v328_v4 = vld [vmem:[%s1350_s20 + $0xe0] sm:$0xff]  ;;  %v327_v5 = vld [vmem:[%s1350_s20 + $0xd8] sm:$0xff]  ;;  %p291_p7 = scmp.lt.s32.totalorder %s1207_s25, 1  ;;  %p293_p9 = scmp.lt.s32.totalorder %s1038_s4, 3 }
  0x36   : > { %396 = vmatprep.subr.mxu0 %v331_v1  ;;  %v326_v6 = vld [vmem:[%s1350_s20 + $0xd0] sm:$0xff]  ;;  %v325_v7 = vld [vmem:[%s1350_s20 + $0xc8] sm:$0xff]  ;;  %v324_v8 = vld [vmem:[%s1350_s20 + $0xc0] sm:$0xff]  ;;  %s1787_s12 = sld [smem:[#allocation14_spill]] }
  0x37   : > { %397 = vmatpush1.msra.mxu0 %v330_v2  ;;  %v323_v9 = vld [vmem:[%s1350_s20 + $0xb8] sm:$0xff]  ;;  %v322_v10 = vld [vmem:[%s1350_s20 + $0xb0] sm:$0xff]  ;;  %v321_v11 = vld [vmem:[%s1350_s20 + $0xa8] sm:$0xff]  ;;  %s1803_s25 = smov (!%p291_p7, %s1207_s25), 1  ;;  %s1805_s4 = smov (!%p293_p9, %s1038_s4), 3 }
  0x38   : > { %398 = vmatprep.subr.mxu0 %v329_v3  ;;  %v320_v12 = vld [vmem:[%s1350_s20 + $0xa0] sm:$0xff]  ;;  %v319_v13 = vld [vmem:[%s1350_s20 + $0x98] sm:$0xff]  ;;  %v318_v14 = vld [vmem:[%s1350_s20 + $0x90] sm:$0xff]  ;;  %s1039_s11 = sshll.u32 %s1803_s25, 2 }
  0x39   : > { %399 = vmatpush1.msra.mxu0 %v328_v4  ;;  %v317_v15 = vld [vmem:[%s1350_s20 + $0x88] sm:$0xff]  ;;  %v316_v16 = vld [vmem:[%s1350_s20 + $0x80] sm:$0xff]  ;;  %v315_v17 = vld [vmem:[%s1350_s20 + $0x78] sm:$0xff] }
  0x3a   : > { %400 = vmatprep.subr.mxu0 %v327_v5  ;;  %v314_v18 = vld [vmem:[%s1350_s20 + $0x70] sm:$0xff]  ;;  %v313_v19 = vld [vmem:[%s1350_s20 + $0x68] sm:$0xff]  ;;  %v312_v20 = vld [vmem:[%s1350_s20 + $0x60] sm:$0xff] }
  0x3b   : > { %401 = vmatpush1.msra.mxu0 %v326_v6  ;;  %v311_v21 = vld [vmem:[%s1350_s20 + $0x58] sm:$0xff]  ;;  %v310_v22 = vld [vmem:[%s1350_s20 + $0x50] sm:$0xff]  ;;  %v309_v23 = vld [vmem:[%s1350_s20 + $0x48] sm:$0xff] }
  0x3c   : > { %402 = vmatprep.subr.mxu0 %v325_v7  ;;  %v308_v24 = vld [vmem:[%s1350_s20 + $0x40] sm:$0xff]  ;;  %v365_v25 = vld [vmem:[%s1759_s1 + $0x8] sm:$0xff]  ;;  %v307_v26 = vld [vmem:[%s1350_s20 + $0x38] sm:$0xff] }
  0x3d   : > { %403 = vmatpush1.msra.mxu0 %v324_v8  ;;  %460 = vmatprep.mubr.f32.mxu0 %v365_v25  ;;  %v306_v27 = vld [vmem:[%s1350_s20 + $0x30] sm:$0xff]  ;;  %v700_v28 = vld [vmem:[%s1761_s3 + $0x78] sm:$0xff]  ;;  %v305_v29 = vld [vmem:[%s1350_s20 + $0x28] sm:$0xff] }
  0x3e   : > { %404 = vmatprep.subr.mxu0 %v323_v9  ;;  %778 = vperm.xlu1 %1120, %v700_v28   ;;  %v572_v30 = vld [vmem:[%s1760_s2 + $0x78] sm:$0xff]  ;;  %v304_v31 = vld [vmem:[%s1350_s20 + $0x20] sm:$0xff]  ;;  %v570_v32 = vld [vmem:[%s1760_s2 + $0x68] sm:$0xff] }
  0x3f   : > { %405 = vmatpush1.msra.mxu0 %v322_v10  ;;  %650 = vperm.xlu0 %1119, %v572_v30   ;;  %v303_v33 = vld [vmem:[%s1350_s20 + $0x18] sm:$0xff]  ;;  %v571_v34 = vld [vmem:[%s1760_s2 + $0x70] sm:$0xff]  ;;  %v301_v36 = vld [vmem:[%s1350_s20 + $0x8] sm:$0xff] }
  0x40   : > { %406 = vmatprep.subr.mxu0 %v321_v11  ;;  %v302_v35 = vld [vmem:[%s1350_s20 + $0x10] sm:$0xff]  ;;  %v300_v37 = vld [vmem:[%s1350_s20] sm:$0xff]  ;;  %v363_v39 = vld [vmem:[%s1350_s20 + $0x1f8] sm:$0xff] }
  0x41   : > { %407 = vmatpush1.msra.mxu0 %v320_v12  ;;  %v569_v38 = vld [vmem:[%s1760_s2 + $0x60] sm:$0xff]  ;;  %v699_v40 = vld [vmem:[%s1761_s3 + $0x70] sm:$0xff]  ;;  %v361_v42 = vld [vmem:[%s1350_s20 + $0x1e8] sm:$0xff] }
  0x42   : > { %408 = vmatprep.subr.mxu0 %v319_v13  ;;  %640 = vperm.xlu1 %1120, %v570_v32   ;;  %v362_v41 = vld [vmem:[%s1350_s20 + $0x1f0] sm:$0xff]  ;;  %v360_v43 = vld [vmem:[%s1350_s20 + $0x1e0] sm:$0xff]  ;;  %v568_v44 = vld [vmem:[%s1760_s2 + $0x58] sm:$0xff] }
  0x43   : > { %409 = vmatpush1.msra.mxu0 %v318_v14  ;;  %645 = vperm.xlu0 %1119, %v571_v34   ;;  %v359_v45 = vld [vmem:[%s1350_s20 + $0x1d8] sm:$0xff]  ;;  %v698_v46 = vld [vmem:[%s1761_s3 + $0x68] sm:$0xff]  ;;  %v358_v47 = vld [vmem:[%s1350_s20 + $0x1d0] sm:$0xff] }
  0x44   : > { %410 = vmatprep.subr.mxu0 %v317_v15  ;;  %v357_v48 = vld [vmem:[%s1350_s20 + $0x1c8] sm:$0xff]  ;;  %v356_v49 = vld [vmem:[%s1350_s20 + $0x1c0] sm:$0xff]  ;;  %v567_v50 = vld [vmem:[%s1760_s2 + $0x50] sm:$0xff] }
  0x45   : > { %411 = vmatpush1.msra.mxu0 %v316_v16  ;;  %v355_v51 = vld [vmem:[%s1350_s20 + $0x1b8] sm:$0xff]  ;;  %v697_v52 = vld [vmem:[%s1761_s3 + $0x60] sm:$0xff]  ;;  %v354_v53 = vld [vmem:[%s1350_s20 + $0x1b0] sm:$0xff] }
  0x46   : > { %412 = vmatprep.subr.mxu0 %v315_v17  ;;  %635 = vperm.xlu1 %1120, %v569_v38   ;;  %v353_v54 = vld [vmem:[%s1350_s20 + $0x1a8] sm:$0xff]  ;;  %v352_v55 = vld [vmem:[%s1350_s20 + $0x1a0] sm:$0xff]  ;;  %v351_v57 = vld [vmem:[%s1350_s20 + $0x198] sm:$0xff] }
  0x47   : > { %413 = vmatpush1.msra.mxu0 %v314_v18  ;;  %773 = vperm.xlu0 %1119, %v699_v40   ;;  %v566_v56 = vld [vmem:[%s1760_s2 + $0x48] sm:$0xff]  ;;  %v696_v58 = vld [vmem:[%s1761_s3 + $0x58] sm:$0xff]  ;;  %v350_v59 = vld [vmem:[%s1350_s20 + $0x190] sm:$0xff] }
  0x48   : > { %414 = vmatprep.subr.mxu0 %v313_v19  ;;  %v349_v60 = vld [vmem:[%s1350_s20 + $0x188] sm:$0xff]  ;;  %v348_v61 = vld [vmem:[%s1350_s20 + $0x180] sm:$0xff]  ;;  %v347_v63 = vld [vmem:[%s1350_s20 + $0x178] sm:$0xff] }
  0x49   : > { %415 = vmatpush1.msra.mxu0 %v312_v20  ;;  %v565_v62 = vld [vmem:[%s1760_s2 + $0x40] sm:$0xff]  ;;  %v695_v0 = vld [vmem:[%s1761_s3 + $0x50] sm:$0xff]  ;;  %v345_v2 = vld [vmem:[%s1350_s20 + $0x168] sm:$0xff] }
  0x4a   : > { %416 = vmatprep.subr.mxu0 %v311_v21  ;;  %630 = vperm.xlu1 %1120, %v568_v44   ;;  %v346_v1 = vld [vmem:[%s1350_s20 + $0x170] sm:$0xff]  ;;  %v344_v3 = vld [vmem:[%s1350_s20 + $0x160] sm:$0xff]  ;;  %v564_v4 = vld [vmem:[%s1760_s2 + $0x38] sm:$0xff] }
  0x4b   : > { %417 = vmatpush1.msra.mxu0 %v310_v22  ;;  %768 = vperm.xlu0 %1119, %v698_v46   ;;  %v343_v5 = vld [vmem:[%s1350_s20 + $0x158] sm:$0xff]  ;;  %v694_v6 = vld [vmem:[%s1761_s3 + $0x48] sm:$0xff]  ;;  %v342_v7 = vld [vmem:[%s1350_s20 + $0x150] sm:$0xff] }
  0x4c   : > { %418 = vmatprep.subr.mxu0 %v309_v23  ;;  %v341_v8 = vld [vmem:[%s1350_s20 + $0x148] sm:$0xff]  ;;  %v340_v9 = vld [vmem:[%s1350_s20 + $0x140] sm:$0xff]  ;;  %v563_v10 = vld [vmem:[%s1760_s2 + $0x30] sm:$0xff] }
  0x4d   : > { %419 = vmatpush1.msra.mxu0 %v308_v24  ;;  %v339_v11 = vld [vmem:[%s1350_s20 + $0x138] sm:$0xff]  ;;  %v693_v12 = vld [vmem:[%s1761_s3 + $0x40] sm:$0xff]  ;;  %v338_v13 = vld [vmem:[%s1350_s20 + $0x130] sm:$0xff] }
  0x4e   : > { %420 = vmatprep.subr.mxu0 %v307_v26  ;;  %625 = vperm.xlu1 %1120, %v567_v50   ;;  %v337_v14 = vld [vmem:[%s1350_s20 + $0x128] sm:$0xff]  ;;  %v336_v15 = vld [vmem:[%s1350_s20 + $0x120] sm:$0xff]  ;;  %v335_v17 = vld [vmem:[%s1350_s20 + $0x118] sm:$0xff] }
  0x4f   : > { %421 = vmatpush1.msra.mxu0 %v306_v27  ;;  %763 = vperm.xlu0 %1119, %v697_v52   ;;  %v562_v16 = vld [vmem:[%s1760_s2 + $0x28] sm:$0xff]  ;;  %v692_v18 = vld [vmem:[%s1761_s3 + $0x38] sm:$0xff]  ;;  %v334_v19 = vld [vmem:[%s1350_s20 + $0x110] sm:$0xff] }
  0x50   : > { %422 = vmatprep.subr.mxu0 %v305_v29  ;;  %v333_v20 = vld [vmem:[%s1350_s20 + $0x108] sm:$0xff]  ;;  %v332_v21 = vld [vmem:[%s1350_s20 + $0x100] sm:$0xff]  ;;  %v691_v24 = vld [vmem:[%s1761_s3 + $0x30] sm:$0xff]  ;;  %s296_s20 = sadd.s32 %s1039_s11, %s1805_s4 }
  0x51   : > { %423 = vmatpush1.msra.mxu0 %v304_v31  ;;  %v561_v22 = vld [vmem:[%s1760_s2 + $0x20] sm:$0xff]  ;;  %v367_v25 = vld [vmem:[%s1759_s1 + $0x18] sm:$0xff]  ;;  %v366_v27 = vld [vmem:[%s1759_s1 + $0x10] sm:$0xff]  ;;  %s1040_s21 = sshll.u32 %s296_s20, 2 }
  0x52   : > { %424 = vmatprep.subr.mxu0 %v303_v33  ;;  %620 = vperm.xlu1 %1120, %v566_v56   ;;  %v364_v23 = vld [vmem:[%s1759_s1] sm:$0xff]  ;;  %v560_v26 = vld [vmem:[%s1760_s2 + $0x18] sm:$0xff]  ;;  %v690_v28 = vld [vmem:[%s1761_s3 + $0x28] sm:$0xff]  ;;  %s298_s8 = scalar_lea.vmem %s1787_s12, %s1040_s21 }
  0x53   : > { %425 = vmatpush1.msra.mxu0 %v302_v35  ;;  %758 = vperm.xlu0 %1119, %v696_v58   ;;  %v369_v29 = vld [vmem:[%s1759_s1 + $0x28] sm:$0xff]  ;;  %v559_v30 = vld [vmem:[%s1760_s2 + $0x10] sm:$0xff]  ;;  %v368_v31 = vld [vmem:[%s1759_s1 + $0x20] sm:$0xff] }
  0x54   : > { %426 = vmatprep.subr.mxu0 %v301_v36  ;;  %v689_v32 = vld [vmem:[%s1761_s3 + $0x20] sm:$0xff]  ;;  %v371_v33 = vld [vmem:[%s1759_s1 + $0x38] sm:$0xff]  ;;  %v558_v34 = vld [vmem:[%s1760_s2 + $0x8] sm:$0xff] }
  0x55   : > { %427 = vmatpush1.msra.mxu0 %v300_v37  ;;  %v370_v35 = vld [vmem:[%s1759_s1 + $0x30] sm:$0xff]  ;;  %v688_v36 = vld [vmem:[%s1761_s3 + $0x18] sm:$0xff]  ;;  %v373_v37 = vld [vmem:[%s1759_s1 + $0x48] sm:$0xff] }
  0x56   : > { %428 = vmatprep.subr.mxu0 %v363_v39  ;;  %615 = vperm.xlu1 %1120, %v565_v62   ;;  %v557_v38 = vld [vmem:[%s1760_s2] sm:$0xff]  ;;  %v687_v40 = vld [vmem:[%s1761_s3 + $0x10] sm:$0xff]  ;;  %v686_v44 = vld [vmem:[%s1761_s3 + $0x8] sm:$0xff] }
  0x57   : > { %429 = vmatpush2.msra.mxu0 %v362_v41  ;;  %753 = vperm.xlu0 %1119, %v695_v0   ;;  %v372_v39 = vld [vmem:[%s1759_s1 + $0x40] sm:$0xff]  ;;  %v375_v41 = vld [vmem:[%s1759_s1 + $0x58] sm:$0xff]  ;;  %v381_v50 = vld [vmem:[%s1759_s1 + $0x88] sm:$0xff] }
  0x58   : > { %430 = vmatprep.subr.mxu0 %v361_v42  ;;  %v685_v42 = vld [vmem:[%s1761_s3] sm:$0xff]  ;;  %v383_v52 = vld [vmem:[%s1759_s1 + $0x98] sm:$0xff]  ;;  %v389_v58 = vld [vmem:[%s1759_s1 + $0xc8] sm:$0xff] }
  0x59   : > { %431 = vmatpush2.msra.mxu0 %v360_v43  ;;  %v374_v43 = vld [vmem:[%s1759_s1 + $0x50] sm:$0xff]  ;;  %v376_v46 = vld [vmem:[%s1759_s1 + $0x60] sm:$0xff]  ;;  %v387_v56 = vld [vmem:[%s1759_s1 + $0xb8] sm:$0xff] }
  0x5a   : > { %432 = vmatprep.subr.mxu0 %v359_v45  ;;  %610 = vperm.xlu1 %1120, %v564_v4   ;;  %v377_v45 = vld [vmem:[%s1759_s1 + $0x68] sm:$0xff]  ;;  %v395_v0 = vld [vmem:[%s1759_s1 + $0xf8] sm:$0xff] }
  0x5b   : > { %433 = vmatpush2.msra.mxu0 %v358_v47  ;;  %748 = vperm.xlu0 %1119, %v694_v6   ;;  %v846_v47 = vld [vmem:[%s1763_s5] sm:$0x7]  ;;  %v393_v62 = vld [vmem:[%s1759_s1 + $0xe8] sm:$0xff] }
  0x5c   : > { %434 = vmatprep.subr.mxu0 %v357_v48  ;;  %v379_v48 = vld [vmem:[%s1759_s1 + $0x78] sm:$0xff] }
  0x5d   : > { %435 = vmatpush2.msra.mxu0 %v356_v49  ;;  %v378_v49 = vld [vmem:[%s1759_s1 + $0x70] sm:$0xff] }
  0x5e   : > { %436 = vmatprep.subr.mxu0 %v355_v51  ;;  %605 = vperm.xlu1 %1120, %v563_v10   ;;  %v380_v51 = vld [vmem:[%s1759_s1 + $0x80] sm:$0xff] }
  0x5f   : > { %437 = vmatpush2.msra.mxu0 %v354_v53  ;;  %743 = vperm.xlu0 %1119, %v693_v12   ;;  %v382_v53 = vld [vmem:[%s1759_s1 + $0x90] sm:$0xff] }
  0x60   : > { %438 = vmatprep.subr.mxu0 %v353_v54  ;;  %v385_v54 = vld [vmem:[%s1759_s1 + $0xa8] sm:$0xff] }
  0x61   : > { %439 = vmatpush2.msra.mxu0 %v352_v55  ;;  %v384_v55 = vld [vmem:[%s1759_s1 + $0xa0] sm:$0xff] }
  0x62   : > { %440 = vmatprep.subr.mxu0 %v351_v57  ;;  %600 = vperm.xlu1 %1120, %v562_v16   ;;  %v386_v57 = vld [vmem:[%s1759_s1 + $0xb0] sm:$0xff] }
  0x63   : > { %441 = vmatpush2.msra.mxu0 %v350_v59  ;;  %738 = vperm.xlu0 %1119, %v692_v18   ;;  %v388_v59 = vld [vmem:[%s1759_s1 + $0xc0] sm:$0xff] }
  0x64   : > { %442 = vmatprep.subr.mxu0 %v349_v60  ;;  %v391_v60 = vld [vmem:[%s1759_s1 + $0xd8] sm:$0xff] }
  0x65   : > { %443 = vmatpush2.msra.mxu0 %v348_v61  ;;  %v390_v61 = vld [vmem:[%s1759_s1 + $0xd0] sm:$0xff] }
  0x66   : > { %444 = vmatprep.subr.mxu0 %v347_v63  ;;  %595 = vperm.xlu1 %1120, %v561_v22   ;;  %v392_v63 = vld [vmem:[%s1759_s1 + $0xe0] sm:$0xff] }
  0x67   : > { %445 = vmatpush2.msra.mxu0 %v346_v1  ;;  %733 = vperm.xlu0 %1119, %v691_v24   ;;  %v394_v1 = vld [vmem:[%s1759_s1 + $0xf0] sm:$0xff] }
  0x68   : > { %446 = vmatprep.subr.mxu0 %v345_v2  ;;  %v1226_v2 = vmov 0.0  }
  0x69   : > { %447 = vmatpush2.msra.mxu0 %v344_v3  ;;  %916 = vmatprep.mubr.f32.mxu1 %v1226_v2 }
  0x6a   : > { %448 = vmatprep.subr.mxu0 %v343_v5  ;;  %590 = vperm.xlu1 %1120, %v560_v26  }
  0x6b   : > { %449 = vmatpush2.msra.mxu0 %v342_v7  ;;  %728 = vperm.xlu0 %1119, %v690_v28  }
  0x6c   : > { %450 = vmatprep.subr.mxu0 %v341_v8 }
  0x6d   : > { %451 = vmatpush2.msra.mxu0 %v340_v9 }
  0x6e   : > { %452 = vmatprep.subr.mxu0 %v339_v11  ;;  %585 = vperm.xlu1 %1120, %v559_v30  }
  0x6f   : > { %453 = vmatpush2.msra.mxu0 %v338_v13  ;;  %723 = vperm.xlu0 %1119, %v689_v32  }
  0x70   : > { %454 = vmatprep.subr.mxu0 %v337_v14 }
  0x71   : > { %455 = vmatpush2.msra.mxu0 %v336_v15 }
  0x72   : > { %456 = vmatprep.subr.mxu0 %v335_v17  ;;  %580 = vperm.xlu1 %1120, %v558_v34  }
  0x73   : > { %457 = vmatpush2.msra.mxu0 %v334_v19  ;;  %718 = vperm.xlu0 %1119, %v688_v36  }
  0x74   : > { %458 = vmatprep.subr.mxu0 %v333_v20 }
  0x75   : > { %459 = vmatpush2.msra.mxu0 %v332_v21 }
  0x76   : > { %461 = vmatmul.mubr.f32.vlgmr.msra.gmra.mxu0 %v364_v23  ;;  %575 = vperm.xlu1 %1120, %v557_v38  }
  0x77   : > { %466 = vmatprep.mubr.f32.mxu0 %v367_v25  ;;  %713 = vperm.xlu0 %1119, %v687_v40  }
  0x7a   : > { %467 = vmatmul.mubr.f32.gmra.mxu0 %v366_v27  ;;  %703 = vperm.xlu1 %1120, %v685_v42  }
  0x7b   : > { %472 = vmatprep.mubr.f32.mxu0 %v369_v29  ;;  %708 = vperm.xlu0 %1119, %v686_v44  }
  0x7e   : > { %473 = vmatmul.mubr.f32.gmra.mxu0 %v368_v31 }
  0x7f   : > { %478 = vmatprep.mubr.f32.mxu0 %v371_v33  ;;  %849 = vperm.xlu0 %1119, %v846_v47  }
  0x82   : > { %479 = vmatmul.mubr.f32.gmra.mxu0 %v370_v35 }
  0x83   : > { %484 = vmatprep.mubr.f32.mxu0 %v373_v37 }
  0x86   : > { %485 = vmatmul.mubr.f32.gmra.mxu0 %v372_v39 }
  0x87   : > { %490 = vmatprep.mubr.f32.mxu0 %v375_v41 }
  0x8a   : > { %491 = vmatmul.mubr.f32.gmra.mxu0 %v374_v43 }
  0x8b   : > { %496 = vmatprep.mubr.f32.mxu0 %v377_v45 }
  0x8e   : > { %497 = vmatmul.mubr.f32.gmra.mxu0 %v376_v46 }
  0x8f   : > { %502 = vmatprep.mubr.f32.mxu0 %v379_v48 }
  0x92   : > { %503 = vmatmul.mubr.f32.gmra.mxu0 %v378_v49 }
  0x93   : > { %508 = vmatprep.mubr.f32.mxu0 %v381_v50 }
  0x96   : > { %509 = vmatmul.mubr.f32.gmra.mxu0 %v380_v51 }
  0x97   : > { %514 = vmatprep.mubr.f32.mxu0 %v383_v52 }
  0x9a   : > { %515 = vmatmul.mubr.f32.gmra.mxu0 %v382_v53 }
  0x9b   : > { %520 = vmatprep.mubr.f32.mxu0 %v385_v54 }
  0x9e   : > { %521 = vmatmul.mubr.f32.gmra.mxu0 %v384_v55 }
  0x9f   : > { %526 = vmatprep.mubr.f32.mxu0 %v387_v56 }
  0xa2   : > { %527 = vmatmul.mubr.f32.gmra.mxu0 %v386_v57 }
  0xa3   : > { %532 = vmatprep.mubr.f32.mxu0 %v389_v58 }
  0xa6   : > { %533 = vmatmul.mubr.f32.gmra.mxu0 %v388_v59 }
  0xa7   : > { %538 = vmatprep.mubr.f32.mxu0 %v391_v60 }
  0xaa   : > { %539 = vmatmul.mubr.f32.gmra.mxu0 %v390_v61 }
  0xab   : > { %544 = vmatprep.mubr.f32.mxu0 %v393_v62 }
  0xae   : > { %545 = vmatmul.mubr.f32.gmra.mxu0 %v392_v63 }
  0xaf   : > { %550 = vmatprep.mubr.f32.mxu0 %v395_v0 }
  0xb2   : > { %551 = vmatmul.mubr.f32.gmra.mxu0 %v394_v1 }
  0xb9   : > { %v779_v5 = vpop.permute.xlu1 %778 }
  0xba   : > { %v651_v3 = vpop.permute.xlu0 %650 }
  0xbd   : > { %v641_v10 = vpop.permute.xlu1 %640 }
  0xbe   : > { %v646_v8 = vpop.permute.xlu0 %645 }
  0xc1   : > { %v636_v15 = vpop.permute.xlu1 %635 }
  0xc2   : > { %v774_v13 = vpop.permute.xlu0 %773 }
  0xc5   : > { %v631_v20 = vpop.permute.xlu1 %630 }
  0xc6   : > { %v769_v18 = vpop.permute.xlu0 %768 }
  0xc9   : > { %v626_v25 = vpop.permute.xlu1 %625 }
  0xca   : > { %v764_v23 = vpop.permute.xlu0 %763 }
  0xcd   : > { %v621_v30 = vpop.permute.xlu1 %620 }
  0xce   : > { %v1645_v28 = vpop.permute.xlu0 %758 }
  0xd1   : > { %v1655_v35 = vpop.permute.xlu1 %615 }
  0xd2   : > { %v1653_v33 = vpop.permute.xlu0 %753 }
  0xd5   : > { %v1659_v40 = vpop.permute.xlu1 %610 }
  0xd6   : > { %v1657_v38 = vpop.permute.xlu0 %748 }
  0xd9   : > { %v1663_v45 = vpop.permute.xlu1 %605 }
  0xda   : > { %v1661_v43 = vpop.permute.xlu0 %743 }
  0xdd   : > { %v1667_v50 = vpop.permute.xlu1 %600 }
  0xde   : > { %v1665_v48 = vpop.permute.xlu0 %738 }
  0xe1   : > { %v1671_v55 = vpop.permute.xlu1 %595 }
  0xe2   : > { %v1669_v53 = vpop.permute.xlu0 %733 }
  0xe6   : > { %v1673_v0 = vpop.permute.xlu0 %728 }
 0x136   : > { %v1615_v4 = vpop.f32.mrf.mxu0 }
 0x137   : > { %1772 = vst [vmem:[#allocation6_spill] sm:$0xff] %v1615_v4 }
 0x138   : > { %v1617_v6 = vpop.f32.mrf.mxu0 }
 0x139   : > { %1773 = vst [vmem:[#allocation7_spill] sm:$0xff] %v1617_v6 }
 0x13a   : > { %v1619_v7 = vpop.f32.mrf.mxu0 }
 0x13b   : > { %1774 = vst [vmem:[#allocation8_spill] sm:$0xff] %v1619_v7 }
 0x13c   : > { %v1621_v9 = vpop.f32.mrf.mxu0 }
 0x13d   : > { %1775 = vst [vmem:[#allocation9_spill] sm:$0xff] %v1621_v9  ;;  %v1675_v9 = vpop.permute.xlu1 %590 }
 0x13e   : > { %v1623_v11 = vpop.f32.mrf.mxu0 }
 0x13f   : > { %1776 = vst [vmem:[#allocation10_spill] sm:$0xff] %v1623_v11 }
 0x140   : > { %v1625_v12 = vpop.f32.mrf.mxu0 }
 0x141   : > { %1777 = vst [vmem:[#allocation11_spill] sm:$0xff] %v1625_v12 }
 0x142   : > { %v1627_v14 = vpop.f32.mrf.mxu0 }
 0x143   : > { %1778 = vst [vmem:[#allocation12_spill] sm:$0xff] %v1627_v14 }
 0x144   : > { %v1629_v16 = vpop.f32.mrf.mxu0 }
 0x146   : > { %v1631_v17 = vpop.f32.mrf.mxu0 }
 0x148   : > { %v1633_v19 = vpop.f32.mrf.mxu0 }
 0x14a   : > { %v1635_v21 = vpop.f32.mrf.mxu0 }
 0x14c   : > { %v1637_v22 = vpop.f32.mrf.mxu0 }
 0x14e   : > { %v1639_v24 = vpop.f32.mrf.mxu0 }
 0x150   : > { %v1641_v26 = vpop.f32.mrf.mxu0 }
 0x152   : > { %v1643_v27 = vpop.f32.mrf.mxu0 }
 0x154   : > { %v1647_v29 = vpop.f32.mrf.mxu0 }
 0x156   : > { %v1649_v31 = vpop.f32.mrf.mxu0 }
 0x158   : > { %v1651_v32 = vpop.f32.mrf.mxu0 }
 0x15a   : > { %v516_v34 = vpop.f32.mrf.mxu0 }
 0x15c   : > { %v518_v36 = vpop.f32.mrf.mxu0 }
 0x15e   : > { %v522_v37 = vpop.f32.mrf.mxu0 }
 0x160   : > { %v524_v39 = vpop.f32.mrf.mxu0 }
 0x162   : > { %v528_v41 = vpop.f32.mrf.mxu0 }
 0x164   : > { %v530_v42 = vpop.f32.mrf.mxu0 }
 0x165   : > { %v676_v11 = vmul.f32 %v631_v20, %v530_v42  ;;  %v671_v42 = vmul.f32 %v621_v30, %v516_v34 }
 0x166   : > { %v534_v44 = vpop.f32.mrf.mxu0 }
 0x167   : > { %v677_v6 = vmul.f32 %v636_v15, %v534_v44  ;;  %v799_v34 = vadd.f32 %v1657_v38, %v671_v42 }
 0x168   : > { %v536_v46 = vpop.f32.mrf.mxu0 }
 0x169   : > { %v678_v1 = vmul.f32 %v636_v15, %v536_v46  ;;  %v1677_v46 = vpop.permute.xlu0 %723 }
 0x16a   : > { %v540_v47 = vpop.f32.mrf.mxu0 }
 0x16b   : > { %v679_v62 = vmul.f32 %v641_v10, %v540_v47  ;;  %v805_v47 = vadd.f32 %v764_v23, %v677_v6 }
 0x16c   : > { %v542_v49 = vpop.f32.mrf.mxu0 }
 0x16d   : > { %v680_v60 = vmul.f32 %v641_v10, %v542_v49  ;;  %v806_v49 = vadd.f32 %v764_v23, %v678_v1  ;;  %v673_v10 = vmul.f32 %v626_v25, %v522_v37  ;;  %v669_v23 = vmul.f32 %v1655_v35, %v1649_v31  ;;  %v719_v37 = vpop.permute.xlu0 %718 }
 0x16e   : > { %v546_v51 = vpop.f32.mrf.mxu0  ;;  %v666_v31 = vmul.f32 %v1663_v45, %v1641_v26  ;;  %v663_v26 = vmul.f32 %v1667_v50, %v1635_v21  ;;  %v660_v21 = vmul.f32 %v1675_v9, %v1629_v16 }
 0x16f   : > { %v681_v58 = vmul.f32 %v646_v8, %v546_v51  ;;  %v808_v12 = vadd.f32 %v769_v18, %v680_v60  ;;  %v674_v51 = vmul.f32 %v626_v25, %v524_v39  ;;  %v668_v25 = vmul.f32 %v1659_v40, %v1647_v29 }
 0x170   : > { %v548_v52 = vpop.f32.mrf.mxu0  ;;  %v665_v29 = vmul.f32 %v1663_v45, %v1639_v24  ;;  %v797_v39 = vadd.f32 %v1661_v43, %v669_v23  ;;  %v662_v24 = vmul.f32 %v1671_v55, %v1633_v19  ;;  %v1779_v19 = vld [vmem:[#allocation12_spill] sm:$0xff] }
 0x171   : > { %v682_v56 = vmul.f32 %v646_v8, %v548_v52  ;;  %v809_v7 = vadd.f32 %v774_v13, %v681_v58  ;;  %v675_v52 = vmul.f32 %v631_v20, %v528_v41  ;;  %v840_v15 = vmax.f32 %v808_v12, 0.0  ;;  %v586_v20 = vpop.permute.xlu1 %585 }
 0x172   : > { %v552_v54 = vpop.f32.mrf.mxu0  ;;  %v802_v6 = vadd.f32 %v1653_v33, %v674_v51  ;;  %v837_v12 = vmax.f32 %v805_v47, 0.0  ;;  %v831_v58 = vmax.f32 %v799_v34, 0.0  ;;  %v829_v60 = vmax.f32 %v797_v39, 0.0 }
 0x173   : > { %v683_v57 = vmul.f32 %v651_v3, %v552_v54  ;;  %v810_v2 = vadd.f32 %v774_v13, %v682_v56  ;;  %v807_v54 = vadd.f32 %v769_v18, %v679_v62  ;;  %v804_v13 = vadd.f32 %v1645_v28, %v676_v11 }
 0x174   : > { %v554_v59 = vpop.f32.mrf.mxu0  ;;  %v801_v11 = vadd.f32 %v1653_v33, %v673_v10  ;;  %v659_v62 = vmul.f32 %v1675_v9, %v1779_v19  ;;  %v788_v9 = vadd.f32 %v719_v37, %v660_v21 }
 0x175   : > { %v684_v61 = vmul.f32 %v651_v3, %v554_v59  ;;  %v811_v63 = vadd.f32 %v779_v5, %v683_v57  ;;  %v842_v3 = vmax.f32 %v810_v2, 0.0  ;;  %v841_v57 = vmax.f32 %v809_v7, 0.0 }
 0x176   : > { %v839_v18 = vmax.f32 %v807_v54, 0.0  ;;  %v838_v7 = vmax.f32 %v806_v49, 0.0  ;;  %v833_v41 = vmax.f32 %v801_v11, 0.0  ;;  %v793_v59 = vadd.f32 %v1669_v53, %v665_v29  ;;  %v1781_v54 = vld [vmem:[#allocation10_spill] sm:$0xff]  ;;  %v1782_v49 = vld [vmem:[#allocation9_spill] sm:$0xff] }
 0x177   : > { %v812_v4 = vadd.f32 %v779_v5, %v684_v61  ;;  %v843_v8 = vmax.f32 %v811_v63, 0.0  ;;  %v672_v5 = vmul.f32 %v621_v30, %v518_v36  ;;  %v836_v30 = vmax.f32 %v804_v13, 0.0  ;;  %v714_v61 = vpop.permute.xlu0 %713  ;;  %v1784_v13 = vld [vmem:[#allocation7_spill] sm:$0xff] }
 0x178   : > { %v791_v63 = vadd.f32 %v1673_v0, %v663_v26  ;;  %v790_v2 = vadd.f32 %v1677_v46, %v662_v24  ;;  %v657_v16 = vmul.f32 %v586_v20, %v1781_v54  ;;  %v825_v51 = vmax.f32 %v793_v59, 0.0 }
 0x179   : > { %v844_v14 = vmax.f32 %v812_v4, 0.0  ;;  %v803_v4 = vadd.f32 %v1645_v28, %v675_v52  ;;  %v800_v28 = vadd.f32 %v1657_v38, %v672_v5  ;;  %v664_v38 = vmul.f32 %v1667_v50, %v1637_v22 }
 0x17a   : > { %v661_v22 = vmul.f32 %v1671_v55, %v1631_v17  ;;  %v1780_v55 = vld [vmem:[#allocation11_spill] sm:$0xff]  ;;  %v823_v5 = vmax.f32 %v791_v63, 0.0  ;;  %v820_v11 = vmax.f32 %v788_v9, 0.0 }
 0x17b   : > { %852 = vmatprep.subr.mxu1 %v844_v14  ;;  %v670_v14 = vmul.f32 %v1655_v35, %v1651_v32  ;;  %v667_v32 = vmul.f32 %v1659_v40, %v1643_v27  ;;  %v835_v36 = vmax.f32 %v803_v4, 0.0  ;;  %v834_v35 = vmax.f32 %v802_v6, 0.0  ;;  %v581_v27 = vpop.permute.xlu1 %580  ;;  %v709_v42 = vpop.permute.xlu0 %708 }
 0x17c   : > { %853 = vmatpush1.msra.mxu1 %v843_v8  ;;  %v796_v40 = vadd.f32 %v1665_v48, %v668_v25  ;;  %v832_v44 = vmax.f32 %v800_v28, 0.0  ;;  %v789_v8 = vadd.f32 %v1677_v46, %v661_v22 }
 0x17d   : > { %854 = vmatprep.subr.mxu1 %v842_v3  ;;  %v798_v33 = vadd.f32 %v1661_v43, %v670_v14  ;;  %v795_v56 = vadd.f32 %v1665_v48, %v667_v32  ;;  %v794_v43 = vadd.f32 %v1669_v53, %v666_v31  ;;  %v792_v48 = vadd.f32 %v1673_v0, %v664_v38  ;;  %v1783_v0 = vld [vmem:[#allocation8_spill] sm:$0xff] }
 0x17e   : > { %855 = vmatpush1.msra.mxu1 %v841_v57  ;;  %v828_v50 = vmax.f32 %v796_v40, 0.0  ;;  %v658_v53 = vmul.f32 %v586_v20, %v1780_v55  ;;  %v656_v3 = vmul.f32 %v581_v27, %v1782_v49  ;;  %v655_v47 = vmul.f32 %v581_v27, %v1783_v0  ;;  %v1785_v20 = vld [vmem:[#allocation6_spill] sm:$0xff] }
 0x17f   : > { %856 = vmatprep.subr.mxu1 %v840_v15  ;;  %v830_v45 = vmax.f32 %v798_v33, 0.0  ;;  %v827_v1 = vmax.f32 %v795_v56, 0.0  ;;  %v576_v17 = vpop.permute.xlu1 %575  ;;  %v826_v52 = vmax.f32 %v794_v43, 0.0  ;;  %v824_v10 = vmax.f32 %v792_v48, 0.0  ;;  %v850_v29 = vpop.permute.xlu0 %849 }
 0x180   : > { %857 = vmatpush1.msra.mxu1 %v839_v18  ;;  %v787_v57 = vadd.f32 %v719_v37, %v659_v62  ;;  %v654_v15 = vmul.f32 %v576_v17, %v1784_v13  ;;  %v786_v4 = vadd.f32 %v714_v61, %v658_v53  ;;  %v822_v18 = vmax.f32 %v790_v2, 0.0 }
 0x181   : > { %858 = vmatprep.subr.mxu1 %v838_v7  ;;  %v653_v46 = vmul.f32 %v576_v17, %v1785_v20  ;;  %v785_v14 = vadd.f32 %v714_v61, %v657_v16  ;;  %v821_v6 = vmax.f32 %v789_v8, 0.0  ;;  %v784_v23 = vadd.f32 %v709_v42, %v656_v3 }
 0x182   : > { %859 = vmatpush1.msra.mxu1 %v837_v12  ;;  %v783_v12 = vadd.f32 %v709_v42, %v655_v47  ;;  %v819_v25 = vmax.f32 %v787_v57, 0.0 }
 0x183   : > { %860 = vmatprep.subr.mxu1 %v836_v30  ;;  %v704_v7 = vpop.permute.xlu1 %703  ;;  %v818_v30 = vmax.f32 %v786_v4, 0.0  ;;  %v817_v34 = vmax.f32 %v785_v14, 0.0 }
 0x184   : > { %861 = vmatpush1.msra.mxu1 %v835_v36  ;;  %v782_v28 = vadd.f32 %v704_v7, %v654_v15  ;;  %v781_v32 = vadd.f32 %v704_v7, %v653_v46  ;;  %v816_v36 = vmax.f32 %v784_v23, 0.0  ;;  %v815_v37 = vmax.f32 %v783_v12, 0.0 }
 0x185   : > { %862 = vmatprep.subr.mxu1 %v834_v35  ;;  %v845_v35 = vld [vmem:[%s1786_s19] sm:$0x7] }
 0x186   : > { %863 = vmatpush1.msra.mxu1 %v833_v41  ;;  %v814_v31 = vmax.f32 %v782_v28, 0.0  ;;  %v813_v33 = vmax.f32 %v781_v32, 0.0 }
 0x187   : > { %864 = vmatprep.subr.mxu1 %v832_v44 }
 0x188   : > { %865 = vmatpush1.msra.mxu1 %v831_v58 }
 0x189   : > { %866 = vmatprep.subr.mxu1 %v830_v45 }
 0x18a   : > { %867 = vmatpush1.msra.mxu1 %v829_v60 }
 0x18b   : > { %868 = vmatprep.subr.mxu1 %v828_v50 }
 0x18c   : > { %869 = vmatpush1.msra.mxu1 %v827_v1 }
 0x18d   : > { %870 = vmatprep.subr.mxu1 %v826_v52 }
 0x18e   : > { %871 = vmatpush1.msra.mxu1 %v825_v51 }
 0x18f   : > { %872 = vmatprep.subr.mxu1 %v824_v10 }
 0x190   : > { %873 = vmatpush1.msra.mxu1 %v823_v5 }
 0x191   : > { %874 = vmatprep.subr.mxu1 %v822_v18 }
 0x192   : > { %875 = vmatpush1.msra.mxu1 %v821_v6 }
 0x193   : > { %876 = vmatprep.subr.mxu1 %v820_v11 }
 0x194   : > { %877 = vmatpush1.msra.mxu1 %v819_v25 }
 0x195   : > { %878 = vmatprep.subr.mxu1 %v818_v30 }
 0x196   : > { %879 = vmatpush1.msra.mxu1 %v817_v34 }
 0x197   : > { %880 = vmatprep.subr.mxu1 %v816_v36 }
 0x198   : > { %881 = vmatpush1.msra.mxu1 %v815_v37 }
 0x199   : > { %882 = vmatprep.subr.mxu1 %v814_v31 }
 0x19a   : > { %883 = vmatpush1.msra.mxu1 %v813_v33 }
 0x19b   : > { %917 = vmatmul.mubr.f32.vlgmr.msra.gmra.mxu1 %v845_v35 }
 0x25b   : > { %v918_v39 = vpop.f32.mrf.mxu1 }
 0x25c   : > { %v919_v41 = vadd.f32 %v918_v39, %v850_v29 }
 0x25d   : > { %v920_v27 = vpop.f32.mrf.mxu1 }
 0x25e   : > { %v921_v38 = vadd.f32 %v920_v27, %v850_v29  ;;  %1121 = vtanh.f32 %v919_v41 }
 0x260   : > { %1123 = vtanh.f32 %v921_v38 }
 0x26b   : > { %v1122_v40 = vpop.eup %1121 }
 0x26d   : > { %v1124_v44 = vpop.eup %1123 }
 0x26e   : > { %v927_v26 = vcombine.low %v1122_v40, %v1124_v44 }
 0x270   : > { %929 = vst [vmem:[%s298_s8] sm:$0x77] %v927_v26 }
 0x271 PF: > { %s19_s28 = sadd.s32 1, %s1219_s28   ;;  %s1788_s13 = sld [smem:[#allocation5_spill]] }
 0x272   : > { %p16_p10 = scmp.ge.s32.totalorder %s19_s28, 6   ;;  %s1789_s21 = smov %s1195_s22 }
 0x273   : > { %s1790_s22 = smov %s1199_s23  ;;  %s1791_s23 = smov %s1329_s17 }
 0x274   : > { %s1792_s24 = smov %s1211_s26  ;;  %s1793_s25 = smov %s1215_s27 }
 0x275   : > { %s1795_s27 = smov %s1801_s7  ;;  %18 = sbr.rel (!%p16_p10) target bundleno = 8 (0x8), region = 84 }
 0x277   : > { %s1794_s26 = smov %s1788_s13 }
 0x27a   :  { %960 = vsyncpa [#allocation3], 1 }
 0x27b   :  { %962 = vsyncpa [#allocation3 + $0x1], 1 }

</bundles_post_ra>
